<compile_context>
chip_gen: v5e
topology: v5e:2x2
jax: 0.10.0
libtpu: 0.0.40
codegen_flags: <defaults>
</compile_context>

<pallas_src>
import functools

import jax
import jax.numpy as jnp
from jax.experimental import pallas as pl
from jax.experimental.pallas import tpu as pltpu


_NEG = -1.0e30          # exp(_NEG) == 0.0 in f32 -> padded frames contribute nothing


def _round_up(x, m):
    return ((x + m - 1) // m) * m


def _cdiv(a, b):
    return (a + b - 1) // b


# ----------------------------- Pallas kernel ------------------------------ #

def _exp_idft_ola_kernel(x_ref, basis_ref, o_ref):
    """Fused exp -> windowed inverse-DFT matmul -> in-tile overlap-add.

    x_ref:     (1, Tt, F_pad) f32 log-magnitude frames (padding holds -1e30)
    basis_ref: (F_pad, n_fft) windowed inverse-rFFT cosine basis (bf16 or f32)
    o_ref:     (1, 1, Tt + R - 1, hop) partial overlap-add slab for this tile,
               R = n_fft // hop.  R == 1 degenerates to emitting raw frames.
    """
    a = jnp.exp(x_ref[0])                                   # f32 exp on VPU/EUP (v5e safe)
    frames = jnp.dot(a.astype(basis_ref.dtype), basis_ref[...],
                     preferred_element_type=jnp.float32)    # (Tt, n_fft) on the MXU
    tt, n_fft = frames.shape
    hop = o_ref.shape[-1]
    r_total = n_fft // hop

    o_ref[...] = jnp.zeros_like(o_ref)
    for r in range(r_total):                                # small static unroll
        seg = frames[:, r * hop:(r + 1) * hop].astype(o_ref.dtype)
        o_ref[0, 0, r:r + tt, :] += seg


def _exp_idft_ola(x, basis, *, hop, tile_t, out_dtype=jnp.float32):
    """x: (B, T_pad, F_pad) f32; basis: (F_pad, n_fft).
    Returns (B, n_tiles, tile_t + R - 1, hop) partial-OLA slabs, R = n_fft//hop."""
    B, T_pad, F_pad = x.shape
    Fb, n_fft = basis.shape
    assert Fb == F_pad and T_pad % tile_t == 0 and n_fft % hop == 0
    n_tiles = T_pad // tile_t
    R = n_fft // hop
    slab = tile_t + R - 1
    bpe = jnp.dtype(basis.dtype).itemsize
    ope = jnp.dtype(out_dtype).itemsize

    # Per-step VMEM: double-buffered x / out tiles, resident basis, frames temp.
    vmem_need = (2 * tile_t * F_pad * 4 + 2 * F_pad * n_fft * bpe
                 + 2 * slab * hop * ope + tile_t * n_fft * 4)
    vmem_limit = int(min(32 * 1024 * 1024,
                         max(8 * 1024 * 1024, vmem_need + vmem_need // 2)))

    cost = pl.CostEstimate(
        flops=int(2 * B * T_pad * F_pad * n_fft + B * T_pad * n_fft),
        transcendentals=int(B * T_pad * F_pad),
        bytes_accessed=int(x.size * 4 + basis.size * bpe
                           + B * n_tiles * slab * hop * ope),
    )

    return pl.pallas_call(
        _exp_idft_ola_kernel,
        out_shape=jax.ShapeDtypeStruct((B, n_tiles, slab, hop), out_dtype),
        grid=(B, n_tiles),
        in_specs=[
            pl.BlockSpec((1, tile_t, F_pad), lambda b, i: (b, i, 0)),
            pl.BlockSpec((F_pad, n_fft), lambda b, i: (0, 0)),
        ],
        out_specs=pl.BlockSpec((1, 1, slab, hop), lambda b, i: (b, i, 0, 0)),
        compiler_params=pltpu.CompilerParams(
            dimension_semantics=("parallel", "parallel"),
            vmem_limit_bytes=vmem_limit,
        ),
        cost_estimate=cost,
    )(x, basis)


# ------------------------------- glue / model ----------------------------- #

def make_idft_basis(n_fft):
    """Inverse rFFT of a real (zero-imag) onesided spectrum as (F, n_fft) cosines."""
    F = n_fft // 2 + 1
    f = jnp.arange(F, dtype=jnp.float32)[:, None]
    n = jnp.arange(n_fft, dtype=jnp.float32)[None, :]
    c = jnp.where((f == 0) | ((n_fft % 2 == 0) & (f == n_fft // 2)), 1.0, 2.0)
    return (c * jnp.cos(2.0 * jnp.pi * f * n / n_fft) / n_fft).astype(jnp.float32)


def _istft_window(n_fft, win_length):
    # torch.istft default window = ones(win_length), center-padded to n_fft.
    window = jnp.ones((win_length,), jnp.float32)
    pad_l = (n_fft - win_length) // 2
    return jnp.pad(window, (pad_l, n_fft - win_length - pad_l))


def _window_envelope(window, T, hop, out_len):
    """Overlap-add of window**2 over T frames (tiny, pure JAX, batch-independent)."""
    n_fft = window.shape[0]
    w2 = (window * window).astype(jnp.float32)
    if n_fft % hop == 0:
        R = n_fft // hop
        wr = w2.reshape(R, hop)
        acc = jnp.zeros((T + R - 1, hop), jnp.float32)
        for r in range(R):
            acc = acc.at[r:r + T, :].add(jnp.broadcast_to(wr[r], (T, hop)))
        return acc.reshape((T + R - 1) * hop)[:out_len]
    idx = (jnp.arange(T)[:, None] * hop + jnp.arange(n_fft)[None, :]).reshape(-1)
    return jnp.zeros((out_len,), jnp.float32).at[idx].add(jnp.tile(w2, (T,)))


def vocoder_forward(mel, *, n_fft, hop_length, win_length,
                    max_tile_t=512, mxu_dtype=jnp.bfloat16):
    """mel: (B, n_freq, T) with n_freq == n_fft//2 + 1 (as torch.istft requires)."""
    B, F, T = mel.shape
    assert F == n_fft // 2 + 1, "istft needs n_mels == n_fft//2 + 1 freq bins"

    window = _istft_window(n_fft, win_length)

    # Windowed inverse-DFT basis; contraction dim padded to a 128 multiple.
    basis = make_idft_basis(n_fft) * window[None, :]
    F_pad = _round_up(F, 128)
    basis = jnp.pad(basis, ((0, F_pad - F), (0, 0))).astype(mxu_dtype)

    fused = n_fft % hop_length == 0
    hop_k = hop_length if fused else n_fft      # kernel OLA hop (n_fft <=> no fusion)
    R = n_fft // hop_k

    # Frame-tile size: large rows for the MXU / HBM roofline, VMEM-budget aware,
    # balanced across tiles (no mostly-padded ragged tail), >= 2 grid blocks when
    # batch == 1 (v7x megacore), and >= R-1 so neighbouring tile carries never
    # overlap in the stitch below.
    budget = 24 * 1024 * 1024
    fixed = 2 * F_pad * n_fft * jnp.dtype(mxu_dtype).itemsize
    per_frame = 2 * F_pad * 4 + n_fft * 4 + 2 * hop_k * 4
    cap = max(8, min(max_tile_t, (budget - fixed) // per_frame))
    # TODO(synk): for n_fft >> 2048 the untiled basis alone may exceed the VMEM
    # budget; a column-tiled variant of the kernel would be needed there.
    k = max(1, _cdiv(T, cap))
    if B == 1 and T >= 16:
        k = max(k, 2)                           # keep both v7x TensorCores busy
    tile_t = _round_up(max(_cdiv(T, k), R - 1, 1), 8)
    n_tiles = _cdiv(T, tile_t)
    T_pad = n_tiles * tile_t

    # (B, F, T) -> (B, T, F) frame-major layout; transpose + pad fuse into a
    # single XLA pass under jit.  Pad value -1e30 => exp() == 0 => padded
    # frames / freq bins contribute nothing to the matmul or the fused OLA.
    x = jnp.transpose(mel, (0, 2, 1)).astype(jnp.float32)
    x = jnp.pad(x, ((0, 0), (0, T_pad - T), (0, F_pad - F)), constant_values=_NEG)

    out_len = n_fft + (T - 1) * hop_length
    half = n_fft // 2                           # center=True trim

    if fused:
        slabs = _exp_idft_ola(x, basis, hop=hop_length, tile_t=tile_t,
                              out_dtype=jnp.float32)
        # Stitch tiles: contiguous main blocks + (R-1)-block carries that land
        # at the start of the next tile's region (carries never overlap since
        # tile_t >= R-1).
        main = slabs[:, :, :tile_t, :].reshape(B, n_tiles * tile_t, hop_length)
        y = jnp.pad(main, ((0, 0), (0, R - 1), (0, 0)))       # (B, T_pad+R-1, hop)
        if R > 1:
            carry = slabs[:, :, tile_t:, :]                    # (B, n_tiles, R-1, hop)
            carry = jnp.pad(carry, ((0, 0), (0, 0), (0, tile_t - (R - 1)), (0, 0)))
            carry = carry.reshape(B, n_tiles * tile_t, hop_length)
            carry = jnp.pad(carry, ((0, 0), (tile_t, 0), (0, 0)))[:, :T_pad + R - 1, :]
            y = y + carry
        y = y.reshape(B, (T_pad + R - 1) * hop_length)[:, :out_len]
    else:
        # TODO(synk): hop does not divide n_fft -> overlap-add falls back to an
        # XLA scatter-add outside the kernel (frames emitted in bf16).
        frames = _exp_idft_ola(x, basis, hop=n_fft, tile_t=tile_t,
                               out_dtype=jnp.bfloat16)
        frames = frames.reshape(B, T_pad, n_fft)[:, :T, :].astype(jnp.float32)
        idx = (jnp.arange(T)[:, None] * hop_length
               + jnp.arange(n_fft)[None, :]).reshape(-1)
        y = jax.vmap(lambda fr: jnp.zeros((out_len,), jnp.float32)
                     .at[idx].add(fr.reshape(-1)))(frames)

    env = _window_envelope(window, T, hop_length, out_len)
    y = y / jnp.where(env > 1e-11, env, 1.0)
    return y[:, half:out_len - half]                           # (B, (T-1)*hop)


# Pure-JAX reference (FFT-based, scatter OLA) for correctness of the Pallas path.
def vocoder_reference(mel, *, n_fft, hop_length, win_length):
    B, F, T = mel.shape
    spec = jnp.exp(mel).astype(jnp.complex64)                  # zero imaginary part
    frames = jnp.fft.irfft(jnp.transpose(spec, (0, 2, 1)), n=n_fft).real
    window = _istft_window(n_fft, win_length)
    frames = frames.astype(jnp.float32) * window[None, None, :]
    out_len = n_fft + (T - 1) * hop_length
    idx = (jnp.arange(T)[:, None] * hop_length
           + jnp.arange(n_fft)[None, :]).reshape(-1)
    y = jax.vmap(lambda fr: jnp.zeros((out_len,), jnp.float32)
                 .at[idx].add(fr.reshape(-1)))(frames)
    env = jnp.zeros((out_len,), jnp.float32).at[idx].add(jnp.tile(window ** 2, (T,)))
    y = y / jnp.where(env > 1e-11, env, 1.0)
    half = n_fft // 2
    return y[:, half:out_len - half]


if __name__ == "__main__":
    # Small shapes consistent with the module: n_mels must equal n_fft//2 + 1
    # for torch.istft to accept the tensor.
    n_fft, hop_length, win_length, sample_rate = 16, 4, 16, 16000
    n_mels = n_fft // 2 + 1                                    # 9
    B, T = 2, 8                                                # 16 analysis frames

    key = jax.random.PRNGKey(0)
    mel = 0.5 * jax.random.normal(key, (B, n_mels, T), dtype=jnp.float32)

    fwd = jax.jit(functools.partial(vocoder_forward, n_fft=n_fft,
                                    hop_length=hop_length, win_length=win_length))
    out = jax.block_until_ready(fwd(mel))

    ref = vocoder_reference(mel, n_fft=n_fft, hop_length=hop_length,
                            win_length=win_length)
    assert out.shape == (B, (T - 1) * hop_length), out.shape
    # bf16 MXU operands with f32 accumulation: audio-grade precision
    # (abs error ~1e-2 level vs. the f32 FFT reference).
    assert jnp.allclose(out, ref, atol=5e-2, rtol=5e-2), \
        float(jnp.max(jnp.abs(out - ref)))

    print("KERNEL_OK")
</pallas_src>

<mosaic_0001>
module attributes {stable_mosaic.version = 11 : i64} {
  func.func @_exp_idft_ola_kernel(%arg0: i32, %arg1: i32, %arg2: memref<1x8x128xf32, #tpu.memory_space<vmem>>, %arg3: memref<128x16xbf16, #tpu.memory_space<vmem>>, %arg4: memref<1x1x11x4xf32, #tpu.memory_space<vmem>>) attributes {dimension_semantics = [#tpu.dimension_semantics<parallel>, #tpu.dimension_semantics<parallel>], iteration_bounds = array<i64: 2, 1>, scalar_prefetch = 0 : i64, scratch_operands = 0 : i64, tpu.core_type = #tpu.core_type<tc>, window_params = [{transform_indices = @transform_0, window_bounds = array<i64: 1, 8, 128>}, {pipeline_mode = #tpu.pipeline_mode<synchronous>, transform_indices = @transform_1, window_bounds = array<i64: 128, 16>}, {transform_indices = @transform_2, window_bounds = array<i64: 1, 1, 11, 4>}]} {
    %c0 = arith.constant 0 : index
    %c0_0 = arith.constant 0 : index
    %c0_1 = arith.constant 0 : index
    %0 = vector.load %arg2[%c0, %c0_0, %c0_1] : memref<1x8x128xf32, #tpu.memory_space<vmem>>, vector<1x8x128xf32>
    %1 = vector.shape_cast %0 : vector<1x8x128xf32> to vector<8x128xf32>
    %2 = math.exp %1 : vector<8x128xf32>
    %3 = arith.truncf %2 : vector<8x128xf32> to vector<8x128xbf16>
    %c0_2 = arith.constant 0 : index
    %c0_3 = arith.constant 0 : index
    %4 = vector.load %arg3[%c0_2, %c0_3] : memref<128x16xbf16, #tpu.memory_space<vmem>>, vector<128x16xbf16>
    %cst = arith.constant dense<0.000000e+00> : vector<8x16xf32>
    %5 = tpu.matmul %3, %4, %cst {dimension_numbers = #tpu.dot_dimension_numbers<[1], [0], [0], [1], [0, 0, 1, 1], [], []>} : vector<8x128xbf16>, vector<128x16xbf16>, vector<8x16xf32> -> vector<8x16xf32>
    %cst_4 = arith.constant 0.000000e+00 : f32
    %6 = vector.broadcast %cst_4 : f32 to vector<1x1x11x4xf32>
    %c0_5 = arith.constant 0 : index
    %c0_6 = arith.constant 0 : index
    %c0_7 = arith.constant 0 : index
    %c0_8 = arith.constant 0 : index
    %7 = vector.load %arg4[%c0_5, %c0_6, %c0_7, %c0_8] : memref<1x1x11x4xf32, #tpu.memory_space<vmem>>, vector<1x1x11x4xf32>
    tpu.vector_store %arg4[%c0_5, %c0_6, %c0_7, %c0_8], %6 {strides = array<i32>} : memref<1x1x11x4xf32, #tpu.memory_space<vmem>>, vector<1x1x11x4xf32>,
    %8 = vector.extract_strided_slice %5 {offsets = [0, 0], sizes = [8, 4], strides = [1, 1]} : vector<8x16xf32> to vector<8x4xf32>
    %c0_9 = arith.constant 0 : index
    %c0_10 = arith.constant 0 : index
    %c0_11 = arith.constant 0 : index
    %c0_12 = arith.constant 0 : index
    %9 = vector.load %arg4[%c0_9, %c0_10, %c0_11, %c0_12] : memref<1x1x11x4xf32, #tpu.memory_space<vmem>>, vector<1x1x8x4xf32>
    %10 = vector.shape_cast %9 : vector<1x1x8x4xf32> to vector<8x4xf32>
    %11 = arith.addf %10, %8 : vector<8x4xf32>
    %c0_13 = arith.constant 0 : index
    %c0_14 = arith.constant 0 : index
    %c0_15 = arith.constant 0 : index
    %c0_16 = arith.constant 0 : index
    %12 = vector.load %arg4[%c0_13, %c0_14, %c0_15, %c0_16] : memref<1x1x11x4xf32, #tpu.memory_space<vmem>>, vector<1x1x8x4xf32>
    %13 = vector.shape_cast %12 : vector<1x1x8x4xf32> to vector<8x4xf32>
    %14 = vector.shape_cast %11 : vector<8x4xf32> to vector<1x1x8x4xf32>
    tpu.vector_store %arg4[%c0_13, %c0_14, %c0_15, %c0_16], %14 {strides = array<i32>} : memref<1x1x11x4xf32, #tpu.memory_space<vmem>>, vector<1x1x8x4xf32>,
    %15 = vector.extract_strided_slice %5 {offsets = [0, 4], sizes = [8, 4], strides = [1, 1]} : vector<8x16xf32> to vector<8x4xf32>
    %c0_17 = arith.constant 0 : index
    %c0_18 = arith.constant 0 : index
    %c1 = arith.constant 1 : index
    %c0_19 = arith.constant 0 : index
    %16 = vector.load %arg4[%c0_17, %c0_18, %c1, %c0_19] : memref<1x1x11x4xf32, #tpu.memory_space<vmem>>, vector<1x1x8x4xf32>
    %17 = vector.shape_cast %16 : vector<1x1x8x4xf32> to vector<8x4xf32>
    %18 = arith.addf %17, %15 : vector<8x4xf32>
    %c0_20 = arith.constant 0 : index
    %c0_21 = arith.constant 0 : index
    %c1_22 = arith.constant 1 : index
    %c0_23 = arith.constant 0 : index
    %19 = vector.load %arg4[%c0_20, %c0_21, %c1_22, %c0_23] : memref<1x1x11x4xf32, #tpu.memory_space<vmem>>, vector<1x1x8x4xf32>
    %20 = vector.shape_cast %19 : vector<1x1x8x4xf32> to vector<8x4xf32>
    %21 = vector.shape_cast %18 : vector<8x4xf32> to vector<1x1x8x4xf32>
    tpu.vector_store %arg4[%c0_20, %c0_21, %c1_22, %c0_23], %21 {strides = array<i32>} : memref<1x1x11x4xf32, #tpu.memory_space<vmem>>, vector<1x1x8x4xf32>,
    %22 = vector.extract_strided_slice %5 {offsets = [0, 8], sizes = [8, 4], strides = [1, 1]} : vector<8x16xf32> to vector<8x4xf32>
    %c0_24 = arith.constant 0 : index
    %c0_25 = arith.constant 0 : index
    %c2 = arith.constant 2 : index
    %c0_26 = arith.constant 0 : index
    %23 = vector.load %arg4[%c0_24, %c0_25, %c2, %c0_26] : memref<1x1x11x4xf32, #tpu.memory_space<vmem>>, vector<1x1x8x4xf32>
    %24 = vector.shape_cast %23 : vector<1x1x8x4xf32> to vector<8x4xf32>
    %25 = arith.addf %24, %22 : vector<8x4xf32>
    %c0_27 = arith.constant 0 : index
    %c0_28 = arith.constant 0 : index
    %c2_29 = arith.constant 2 : index
    %c0_30 = arith.constant 0 : index
    %26 = vector.load %arg4[%c0_27, %c0_28, %c2_29, %c0_30] : memref<1x1x11x4xf32, #tpu.memory_space<vmem>>, vector<1x1x8x4xf32>
    %27 = vector.shape_cast %26 : vector<1x1x8x4xf32> to vector<8x4xf32>
    %28 = vector.shape_cast %25 : vector<8x4xf32> to vector<1x1x8x4xf32>
    tpu.vector_store %arg4[%c0_27, %c0_28, %c2_29, %c0_30], %28 {strides = array<i32>} : memref<1x1x11x4xf32, #tpu.memory_space<vmem>>, vector<1x1x8x4xf32>,
    %29 = vector.extract_strided_slice %5 {offsets = [0, 12], sizes = [8, 4], strides = [1, 1]} : vector<8x16xf32> to vector<8x4xf32>
    %c0_31 = arith.constant 0 : index
    %c0_32 = arith.constant 0 : index
    %c3 = arith.constant 3 : index
    %c0_33 = arith.constant 0 : index
    %30 = vector.load %arg4[%c0_31, %c0_32, %c3, %c0_33] : memref<1x1x11x4xf32, #tpu.memory_space<vmem>>, vector<1x1x8x4xf32>
    %31 = vector.shape_cast %30 : vector<1x1x8x4xf32> to vector<8x4xf32>
    %32 = arith.addf %31, %29 : vector<8x4xf32>
    %c0_34 = arith.constant 0 : index
    %c0_35 = arith.constant 0 : index
    %c3_36 = arith.constant 3 : index
    %c0_37 = arith.constant 0 : index
    %33 = vector.load %arg4[%c0_34, %c0_35, %c3_36, %c0_37] : memref<1x1x11x4xf32, #tpu.memory_space<vmem>>, vector<1x1x8x4xf32>
    %34 = vector.shape_cast %33 : vector<1x1x8x4xf32> to vector<8x4xf32>
    %35 = vector.shape_cast %32 : vector<8x4xf32> to vector<1x1x8x4xf32>
    tpu.vector_store %arg4[%c0_34, %c0_35, %c3_36, %c0_37], %35 {strides = array<i32>} : memref<1x1x11x4xf32, #tpu.memory_space<vmem>>, vector<1x1x8x4xf32>,
    return
  }
  func.func @transform_0(%arg0: i32, %arg1: i32) -> (i32, i32, i32) {
    %c0_i32 = arith.constant 0 : i32
    %c0_i32_0 = arith.constant 0 : i32
    return %arg0, %arg1, %c0_i32 : i32, i32, i32
  }
  func.func @transform_1(%arg0: i32, %arg1: i32) -> (i32, i32) {
    %c0_i32 = arith.constant 0 : i32
    %c0_i32_0 = arith.constant 0 : i32
    %c0_i32_1 = arith.constant 0 : i32
    return %c0_i32, %c0_i32_0 : i32, i32
  }
  func.func @transform_2(%arg0: i32, %arg1: i32) -> (i32, i32, i32, i32) {
    %c0_i32 = arith.constant 0 : i32
    %c0_i32_0 = arith.constant 0 : i32
    %c0_i32_1 = arith.constant 0 : i32
    return %arg0, %arg1, %c0_i32, %c0_i32_0 : i32, i32, i32, i32
  }
}

</mosaic_0001>

<bundles_post_ra>
// kernel: vocoder_forward.1
= control target key start
LH: loop header
LB: loop body
LE: loop exit
PB: predicated region body
PF: predicated region fallthrough
CT: control target
= control target key end

     0   :  { %s491_s9 = smov 0   ;;  %s493_s10 = smov 0   ;;  %s553_s0 = inlined_call_operand.vmem [shape: f32[2,8,128], index: 0, kind: input, shape index: {}]   ;;  %s554_s1 = inlined_call_operand.vmem [shape: bf16[128,16], index: 1, kind: input, shape index: {}]   ;;  %s555_s2 = inlined_call_operand.vmem [shape: f32[2,1,11,4], index: 2, kind: output, shape index: {}]  }
   0x1   :  { %s495_s11 = smov 0  }
   0x2 LB: > { %s24_s12 = sadd.s32 1, %s466_s10  ;;  %p371_p0 = scmp.ge.s32.totalorder %s470_s11, 1  ;;  %s470_s11 = sphi %s495_s11, %s12_s11   ;;  %s466_s10 = sphi %s493_s10, %s557_s10   ;;  %s462_s9 = sphi %s491_s9, %s556_s9  }
   0x3   : > { %p26_p1 = scmp.ge.s32.totalorder %s24_s12, 2  ;;  %p130_p2 = scmp.lt.s32.totalorder %s470_s11, 3 }
   0x5   : > { %s559_s12 = smov (%p26_p1, %s24_s12), 0  ;;  %p131_p3 = pnand %p371_p0, %p130_p2 }
   0x6   : > { %p158_p4 = scmp.lt.s32.totalorder (!%p131_p3), %s462_s9, 1  ;;  %s473_s13 = smov (!%p131_p3), 116  }
   0x7   : > { %134 = sbr.rel (%p131_p3) target bundleno = 308 (0x134), region = 28  ;;  %s474_s14 = smov (!%p131_p3), 124  }
   0xc   : > { %v417_v0 = vld [vmem:[%s554_s1 + $0x38] sm:$0xff]  ;;  %v416_v1 = vld [vmem:[%s554_s1 + $0x30] sm:$0xff]  ;;  %s561_s9 = smov (!%p158_p4, %s462_s9), 1  ;;  %v415_v2 = vld [vmem:[%s554_s1 + $0x28] sm:$0xff]  ;;  %vm255_vm0 = vcmask 31744   ;;  %v472_v12 = vmov 0.0  }
   0xd   : > { %242 = vmatpush.bf16.msra.mxu0 %v417_v0  ;;  %s372_s19 = sshll.u32 %s561_s9, 3  ;;  %v414_v3 = vld [vmem:[%s554_s1 + $0x20] sm:$0xff]  ;;  %v413_v5 = vld [vmem:[%s554_s1 + $0x18] sm:$0xff]  ;;  %v412_v7 = vld [vmem:[%s554_s1 + $0x10] sm:$0xff]  ;;  %s409_s5 = sshll.u32 %s561_s9, 4  ;;  %vm257_vm1 = vcmask 26624  }
   0xe   : > { %s164_s24 = scalar_lea.vmem %s553_s0, %s372_s19  ;;  %v411_v8 = vld [vmem:[%s554_s1 + $0x8] sm:$0xff]  ;;  %v410_v10 = vld [vmem:[%s554_s1] sm:$0xff]  ;;  %s173_s8 = scalar_lea.vmem %s555_s2, %s409_s5 }
   0xf   : > { %v174_v4 = vld [vmem:[%s164_s24] sm:$0xff]  ;;  %256 = vst.msk [vmem:[%s173_s8] sm:$0xff] %vm255_vm0, %v472_v12  ;;  %s475_s9 = smov 120  }
  0x10   : > { %v175_v6 = vmul.f32 1.442695, %v174_v4  ;;  %258 = vst.msk [vmem:[%s173_s8 + $0x8] sm:$0x7] %vm257_vm1, %v472_v12 }
  0x11   : > { %243 = vmatpush.bf16.msra.mxu0 %v416_v1 }
  0x12   : > { %446 = vpow2.f32 %v175_v6 }
  0x15   : > { %244 = vmatpush.bf16.msra.mxu0 %v415_v2 }
  0x16   : > { %v259_v13 = vld [vmem:[%s173_s8] sm:$0xff] }
  0x18   : > { %v447_v9 = vpop.eup %446 }
  0x19   : > { %245 = vmatpush.bf16.msra.mxu0 %v414_v3  ;;  %v177_v11 = vpack.c.bf16 %v447_v9, %v447_v9 }
  0x1d   : > { %246 = vmatpush.bf16.msra.mxu0 %v413_v5 }
  0x21   : > { %247 = vmatpush.bf16.msra.mxu0 %v412_v7 }
  0x25   : > { %248 = vmatpush.bf16.msra.mxu0 %v411_v8 }
  0x29   : > { %249 = vmatpush.bf16.msra.mxu0 %v410_v10 }
  0x2c   : > { %250 = vmatmul.bf16.vlgmr.msra.gmra.mxu0 %v177_v11 }
  0xa9   : > { %v251_v14 = vpop.f32.mrf.mxu0 }
  0xaa   : > { %v260_v15 = vadd.f32 %v259_v13, %v251_v14  ;;  %276 = vrot.lane.b32.xlu1 %v251_v14, %s473_s13  ;;  %264 = vrot.lane.b32.xlu0 %v251_v14, %s474_s14 }
  0xac   : > { %261 = vst.msk [vmem:[%s173_s8] sm:$0xff] %vm255_vm0, %v260_v15 }
  0xb1   : > { %v253_v16 = vpop.f32.mrf.mxu0 }
  0xb2   : > { %270 = vrot.lane.b32.xlu0 %v251_v14, %s475_s9 }
  0xb3   : > { %v262_v18 = vld [vmem:[%s173_s8 + $0x1] sm:$0xff] }
 0x11c   : > { %v265_v17 = vpop.permute.xlu0 %264  ;;  %v277_v23 = vpop.permute.xlu1 %276 }
 0x11d   : > { %v267_v19 = vadd.f32 %v265_v17, %v262_v18 }
 0x11f   : > { %268 = vst.msk [vmem:[%s173_s8 + $0x1] sm:$0xff] %vm255_vm0, %v267_v19 }
 0x124   : > { %v271_v20 = vpop.permute.xlu0 %270 }
 0x126   : > { %v269_v21 = vld [vmem:[%s173_s8 + $0x2] sm:$0xff] }
 0x127   : > { %v273_v22 = vadd.f32 %v271_v20, %v269_v21 }
 0x129   : > { %274 = vst.msk [vmem:[%s173_s8 + $0x2] sm:$0xff] %vm255_vm0, %v273_v22 }
 0x130   : > { %v275_v24 = vld [vmem:[%s173_s8 + $0x3] sm:$0xff] }
 0x131   : > { %v279_v25 = vadd.f32 %v277_v23, %v275_v24 }
 0x133   : > { %280 = vst.msk [vmem:[%s173_s8 + $0x3] sm:$0xff] %vm255_vm0, %v279_v25 }
 0x134 PF: > { %s12_s11 = sadd.s32 1, %s470_s11   ;;  %s556_s9 = smov %s466_s10 }
 0x135   : > { %p9_p5 = scmp.ge.s32.totalorder %s12_s11, 4   ;;  %s557_s10 = smov %s559_s12 }
 0x137   :  { %11 = sbr.rel (!%p9_p5) target bundleno = 2 (0x2), region = 58 }

</bundles_post_ra>
